<compile_context>
chip_gen: v7x
topology: tpu7x:2x2x1
jax: 0.10.0
libtpu: 0.0.40
codegen_flags: <defaults>
</compile_context>

<pallas_src>
import jax
import jax.numpy as jnp
from jax.experimental import pallas as pl
from jax.experimental.pallas import tpu as pltpu

LANE = 128
TARGET_BLOCK_BYTES = 2 << 20        # ~2 MiB per block (85%+ of HBM roofline)
SUBLANE_MULT = 32                   # row multiple safe for f32 / bf16 / int8 tiling
_SCALE = (1.0 / 1.1) / 1.004        # fold the two sequential divides into one multiply
_MIN_PALLAS_ELEMS = 64 * 1024       # below this, plain jnp beats kernel launch overhead


def _round_up(n, m):
    return ((n + m - 1) // m) * m


def _choose_block(extent, align, cap):
    """Pick a block length along the single grid axis.

    extent : units (rows or flat elems) in the array.
    align  : required block multiple unless the block equals the full extent.
    cap    : max units per block (~2 MiB worth of bytes).

    Guarantees grid >= 2 whenever the extent allows it (so both v7x
    TensorCores get work) and prefers an even grid count for many-block
    inputs (no straggler core).
    """
    if extent <= 2 * align:
        return extent                                   # one full-extent block (always legal)
    blk = min(cap, _round_up(pl.cdiv(extent, 2), align))
    grid = pl.cdiv(extent, blk)
    if grid > 2 and grid % 2 == 1:
        blk = min(blk, _round_up(pl.cdiv(extent, grid + 1), align))
    return blk


def _lipswish_kernel(sp_ref, x_ref, o_ref):
    # sp_ref: SMEM scalar-prefetch ref holding softplus(beta), shape (1,), f32.
    sp = sp_ref[0]
    x = x_ref[...]
    # sp is f32, so bf16 inputs are promoted and computed in f32, then cast back.
    y = x * jax.nn.sigmoid(x * sp)
    o_ref[...] = (y * _SCALE).astype(o_ref.dtype)


def lipswish(x, beta, *, min_pallas_elems=_MIN_PALLAS_ELEMS, donate_x=False):
    """Apply LipSwish elementwise to x (any shape). beta: shape (1,) float param."""
    orig_shape = x.shape
    total = x.size

    # Hoist softplus(beta) out of the kernel (stable form, computed once).
    sp = jax.nn.softplus(beta.astype(jnp.float32)).reshape(1)

    # Small-size fallback: fixed pallas_call launch / pipeline-priming overhead
    # dominates for tiny tensors; XLA's fused elementwise is as fast.
    if total == 0 or total < min_pallas_elems:
        y = x * jax.nn.sigmoid(x * sp)
        return (y * _SCALE).astype(x.dtype).reshape(orig_shape)

    itemsize = jnp.dtype(x.dtype).itemsize
    compiler_params = pltpu.CompilerParams(dimension_semantics=("parallel",))
    # Operand 1 is x (operand 0 is the scalar-prefetch softplus(beta)).
    io_alias = {1: 0} if donate_x else {}

    if total % LANE == 0:
        # Fast path: contiguous reshape only; lane-dense (rows, 128) layout.
        rows = total // LANE
        x2 = x.reshape(rows, LANE)
        cap_rows = max(
            SUBLANE_MULT,
            (TARGET_BLOCK_BYTES // (LANE * itemsize)) // SUBLANE_MULT * SUBLANE_MULT,
        )
        block_rows = _choose_block(rows, SUBLANE_MULT, cap_rows)
        grid = (pl.cdiv(rows, block_rows),)
        out = pl.pallas_call(
            _lipswish_kernel,
            out_shape=jax.ShapeDtypeStruct((rows, LANE), x.dtype),
            grid_spec=pltpu.PrefetchScalarGridSpec(
                num_scalar_prefetch=1,              # softplus(beta) lands in SMEM
                grid=grid,
                # Optional: pipeline_mode=pl.Buffered(3) here if a trace shows exposed DMA.
                in_specs=[pl.BlockSpec((block_rows, LANE), lambda i, sp_ref: (i, 0))],
                out_specs=pl.BlockSpec((block_rows, LANE), lambda i, sp_ref: (i, 0)),
            ),
            input_output_aliases=io_alias,
            compiler_params=compiler_params,
        )(sp, x2)
        return out.reshape(orig_shape)

    # Ragged path: flat 1-D array, 128-aligned blocks; Pallas masks the partial
    # tail block on store.  No padding copy, no slice-back -> 1 read + 1 write.
    xf = x.reshape(-1)
    cap_elems = max(LANE, (TARGET_BLOCK_BYTES // itemsize) // LANE * LANE)
    block_elems = _choose_block(total, LANE, cap_elems)
    grid = (pl.cdiv(total, block_elems),)
    out = pl.pallas_call(
        _lipswish_kernel,
        out_shape=jax.ShapeDtypeStruct((total,), x.dtype),
        grid_spec=pltpu.PrefetchScalarGridSpec(
            num_scalar_prefetch=1,
            grid=grid,
            in_specs=[pl.BlockSpec((block_elems,), lambda i, sp_ref: (i,))],
            out_specs=pl.BlockSpec((block_elems,), lambda i, sp_ref: (i,)),
        ),
        input_output_aliases=io_alias,
        compiler_params=compiler_params,
    )(sp, xf)
    return out.reshape(orig_shape)


def lipswish_ref(x, beta):
    sp = jax.nn.softplus(beta)[0]
    return (x * jax.nn.sigmoid(x * sp)) / 1.1 / 1.004


if __name__ == "__main__":
    # Deterministic parameter init matching nn.Parameter(torch.tensor([0.5]))
    beta = jnp.array([0.5], dtype=jnp.float32)
    k1, k2, k3 = jax.random.split(jax.random.PRNGKey(0), 3)

    # 1) Primary small NCHW input (aligned fast path), forced through the kernel.
    x1 = jax.random.normal(k1, (2, 4, 16, 16), dtype=jnp.float32)
    y1 = jax.block_until_ready(lipswish(x1, beta, min_pallas_elems=0))
    assert y1.shape == x1.shape and y1.dtype == x1.dtype
    assert jnp.allclose(y1, lipswish_ref(x1, beta), atol=1e-6, rtol=1e-5)

    # 2) Larger aligned input -> grid of >= 2 blocks (exercises the megacore split).
    x2 = jax.random.normal(k2, (2, 4, 128, 128), dtype=jnp.float32)
    y2 = jax.block_until_ready(lipswish(x2, beta, min_pallas_elems=0))
    assert y2.shape == x2.shape and y2.dtype == x2.dtype
    assert jnp.allclose(y2, lipswish_ref(x2, beta), atol=1e-6, rtol=1e-5)

    # 3) Ragged input (total % 128 != 0) -> zero-copy flat path with masked tail block.
    x3 = jax.random.normal(k3, (3, 5, 7, 11), dtype=jnp.float32)
    y3 = jax.block_until_ready(lipswish(x3, beta, min_pallas_elems=0))
    assert y3.shape == x3.shape and y3.dtype == x3.dtype
    assert jnp.allclose(y3, lipswish_ref(x3, beta), atol=1e-6, rtol=1e-5)

    # 4) Default call on a tiny tensor -> plain-jnp small-size fallback.
    y4 = jax.block_until_ready(lipswish(x1, beta))
    assert jnp.allclose(y4, lipswish_ref(x1, beta), atol=1e-6, rtol=1e-5)

    print("KERNEL_OK")
</pallas_src>

<mosaic_0001>
module attributes {stable_mosaic.version = 11 : i64} {
  func.func @_lipswish_kernel(%arg0: i32, %arg1: memref<1xf32, #tpu.memory_space<smem>>, %arg2: memref<16x128xf32, #tpu.memory_space<vmem>>, %arg3: memref<16x128xf32, #tpu.memory_space<vmem>>) attributes {dimension_semantics = [#tpu.dimension_semantics<parallel>], iteration_bounds = array<i64: 1>, scalar_prefetch = 1 : i64, scratch_operands = 0 : i64, tpu.core_type = #tpu.core_type<tc>, window_params = [{transform_indices = @transform_0, window_bounds = array<i64: 16, 128>}, {transform_indices = @transform_1, window_bounds = array<i64: 16, 128>}]} {
    %c0 = arith.constant 0 : index
    %0 = memref.load %arg1[%c0] : memref<1xf32, #tpu.memory_space<smem>>
    %c0_0 = arith.constant 0 : index
    %c0_1 = arith.constant 0 : index
    %1 = vector.load %arg2[%c0_0, %c0_1] : memref<16x128xf32, #tpu.memory_space<vmem>>, vector<16x128xf32>
    %2 = vector.broadcast %0 : f32 to vector<16x128xf32>
    %3 = arith.mulf %1, %2 : vector<16x128xf32>
    %4 = arith.negf %3 : vector<16x128xf32>
    %5 = math.exp %4 : vector<16x128xf32>
    %cst = arith.constant 1.000000e+00 : f32
    %6 = vector.broadcast %cst : f32 to vector<16x128xf32>
    %7 = arith.addf %6, %5 : vector<16x128xf32>
    %8 = arith.divf %6, %7 : vector<16x128xf32>
    %9 = arith.mulf %1, %8 : vector<16x128xf32>
    %cst_2 = arith.constant 0.905469059 : f32
    %10 = vector.broadcast %cst_2 : f32 to vector<16x128xf32>
    %11 = arith.mulf %9, %10 : vector<16x128xf32>
    %c0_3 = arith.constant 0 : index
    %c0_4 = arith.constant 0 : index
    %12 = vector.load %arg3[%c0_3, %c0_4] : memref<16x128xf32, #tpu.memory_space<vmem>>, vector<16x128xf32>
    tpu.vector_store %arg3[%c0_3, %c0_4], %11 {strides = array<i32>} : memref<16x128xf32, #tpu.memory_space<vmem>>, vector<16x128xf32>,
    return
  }
  func.func @transform_0(%arg0: i32, %arg1: memref<1xf32, #tpu.memory_space<smem>>) -> (i32, i32) {
    %c0_i32 = arith.constant 0 : i32
    %c0_i32_0 = arith.constant 0 : i32
    return %arg0, %c0_i32 : i32, i32
  }
  func.func @transform_1(%arg0: i32, %arg1: memref<1xf32, #tpu.memory_space<smem>>) -> (i32, i32) {
    %c0_i32 = arith.constant 0 : i32
    %c0_i32_0 = arith.constant 0 : i32
    return %arg0, %c0_i32 : i32, i32
  }
}

</mosaic_0001>

<bundles_post_ra>
// kernel: tpu_custom_call.1
= control target key start
LH: loop header
LB: loop body
LE: loop exit
PB: predicated region body
PF: predicated region fallthrough
CT: control target
= control target key end

     0   :  { %8 = vsyncpa [#allocation5], 0  ;;  %s180_s0 = inlined_call_operand.<no memory space> [shape: f32[1], index: 0, kind: input, shape index: {}]   ;;  %s181_s1 = inlined_call_operand.hbm [shape: f32[16,128], index: 1, kind: input, shape index: {}]   ;;  %s182_s2 = inlined_call_operand.hbm [shape: f32[16,128], index: 2, kind: output, shape index: {}]  }
   0x1   :  { %9 = vsyncpa [#allocation6], 0  ;;  %s128_s9 = smov [#allocation4]   ;;  %s80_s13 = scalar_lea.hbm %s181_s1, 256 }
   0x2   :  { %s15_s10 = sshll.u32 %s128_s9, 4  ;;  %p81_p0 = scmp.ne.s32.totalorder %s181_s1, %s80_s13  ;;  %s16_s10 = int_to_ptr.vmem [resolvable:$true] %s15_s10 }
   0x3   :  { %p84_p1 = scmp.lt.u32.totalorder %s80_s13, %s181_s1 }
   0x5   :  { %p86_p2 = pnand %p84_p1, %p81_p0 }
   0x7   :  { %89 = shalt.err (!%p86_p2)
}
   0x8   :  { %s90_s18 = scalar_lea.vmem %s16_s10, 256  ;;  %p95_p4 = scmp.lt.s32.totalorder %s16_s10, %s16_s10 }
   0x9   :  { %p91_p3 = scmp.ne.s32.totalorder %s16_s10, %s90_s18  ;;  %p96_p5 = scmp.lt.s32.totalorder %s90_s18, %s90_s18 }
   0xb   :  { %p97_p6 = por %p96_p5, %p95_p4 }
   0xd   :  { %p98_p7 = pnand %p97_p6, %p91_p3 }
   0xf   :  { %101 = shalt.err (!%p98_p7)
}
  0x10   :  { %s129_s19 = smov 128   ;;  %s130_s20 = smov 8  }
  0x11   :  { %21 = dma.hbm_to_vmem [thread:$0]  %s181_s1, 256, %s16_s10, [#allocation5], %s129_s19, %s129_s19, %s130_s20  }
  0x12   :  { %124 = dma.done.wait [#allocation5], 256  }
  0x13   :  { %125 = vsyncadd [#allocation5], 4294967040  ;;  %v28_v0 = vstv %s180_s0  ;;  %v26_v1 = vld [vmem:[#allocation4] sm:$0xff]  ;;  %v27_v2 = vld [vmem:[#allocation4 + $0x8] sm:$0xff]  ;;  %s131_s1 = smov [#allocation7]  }
  0x14   :  { %v29_v3 = vmul.f32 %v28_v0, %v26_v1  ;;  %v30_v4 = vmul.f32 %v28_v0, %v27_v2  ;;  %s54_s25 = sshll.u32 %s131_s1, 4  ;;  %s55_s25 = int_to_ptr.vmem [resolvable:$true] %s54_s25 }
  0x15   :  { %s102_s0 = scalar_lea.vmem %s55_s25, 256  ;;  %p107_p9 = scmp.lt.s32.totalorder %s55_s25, %s55_s25 }
  0x16   :  { %v66_v5 = vmul.f32 -1.442695, %v29_v3  ;;  %v67_v6 = vmul.f32 -1.442695, %v30_v4  ;;  %p103_p8 = scmp.ne.s32.totalorder %s55_s25, %s102_s0  ;;  %p108_p10 = scmp.lt.s32.totalorder %s102_s0, %s102_s0 }
  0x18   :  { %72 = vpow2.f32 %v66_v5  ;;  %p109_p11 = por %p108_p10, %p107_p9 }
  0x19   :  { %74 = vpow2.f32 %v67_v6 }
  0x1a   :  { %p110_p12 = pnand %p109_p11, %p103_p8 }
  0x22   :  { %v73_v7 = vpop.eup %72 }
  0x23   :  { %v75_v8 = vpop.eup %74  ;;  %v37_v9 = vadd.f32 1.0, %v73_v7 }
  0x24   :  { %v38_v10 = vadd.f32 1.0, %v75_v8 }
  0x25   :  { %76 = vrcp.f32 %v37_v9 }
  0x26   :  { %78 = vrcp.f32 %v38_v10 }
  0x2f   :  { %v77_v11 = vpop.eup %76 }
  0x30   :  { %v79_v12 = vpop.eup %78  ;;  %v43_v13 = vmul.f32 %v77_v11, %v26_v1 }
  0x31   :  { %v44_v14 = vmul.f32 %v79_v12, %v27_v2 }
  0x32   :  { %v45_v15 = vmul.f32 0.90546906, %v43_v13 }
  0x33   :  { %v46_v16 = vmul.f32 0.90546906, %v44_v14 }
  0x34   :  { %47 = vst [vmem:[#allocation7] sm:$0xff] %v45_v15 }
  0x35   :  { %48 = vst [vmem:[#allocation7 + $0x8] sm:$0xff] %v46_v16 }
  0x36   :  { %113 = shalt.err (!%p110_p12)
}
  0x37   :  { %s114_s28 = scalar_lea.hbm %s182_s2, 256 }
  0x38   :  { %p115_p13 = scmp.ne.s32.totalorder %s182_s2, %s114_s28  ;;  %p118_p0 = scmp.lt.u32.totalorder %s114_s28, %s182_s2 }
  0x3a   :  { %p120_p1 = pnand %p118_p0, %p115_p13 }
  0x3c   :  { %123 = shalt.err (!%p120_p1)
}
  0x3d   :  { %60 = dma.vmem_to_hbm [thread:$0]  %s55_s25, 256, %s182_s2, [#allocation6], %s129_s19, %s129_s19, %s130_s20  }
  0x3e   :  { %126 = dma.done.wait [#allocation6], 256  }
  0x3f   :  { %127 = vsyncadd [#allocation6], 4294967040 }
  0x40   :  { %64 = vsyncpa [#allocation5], 1 }
  0x41   :  { %65 = vsyncpa [#allocation6], 1 }

</bundles_post_ra>
